<compile_context>
chip_gen: v7x
topology: tpu7x:2x2x1
jax: 0.10.0
libtpu: 0.0.40
codegen_flags: <defaults>
</compile_context>

<pallas_src>
import functools

import jax
import jax.numpy as jnp
from jax.experimental import pallas as pl
from jax.experimental.pallas import tpu as pltpu


_NUM_GRID_STEPS = 2            # >=2 keeps both v7x TensorCores busy; ~0.35 us extra on 1-TC chips
_VMEM_BUDGET_BYTES = 24 << 20  # tile budget: safe under v7x's 32 MiB scoped / 64 MiB physical VMEM
_VMEM_LIMIT_BYTES = 32 << 20   # consistent scoped-VMEM limit on all generations


def _round_up(x, m):
    return ((x + m - 1) // m) * m


# --------------------------------------------------------------------- kernels

def _mlp_logits(obs_ref, w1_ref, b1_ref, w2_ref, b2_ref, w3_ref, b3_ref):
    """Linear->Tanh->Linear->Tanh->Linear.  bf16 (or f32) MXU operands with f32
    accumulation; tanh stays f32 (v5e has no bf16 VPU/EUP)."""
    cdt = w1_ref.dtype
    x = obs_ref[...].astype(cdt)
    h1 = jnp.tanh(
        jnp.dot(x, w1_ref[...], preferred_element_type=jnp.float32) + b1_ref[...])
    h2 = jnp.tanh(
        jnp.dot(h1.astype(cdt), w2_ref[...], preferred_element_type=jnp.float32)
        + b2_ref[...])
    # (TB, AP) f32; padded logit columns are ~-1e30 (from the padded bias).
    return (jnp.dot(h2.astype(cdt), w3_ref[...], preferred_element_type=jnp.float32)
            + b3_ref[...])


def _actor_logits_kernel(obs_ref, w1_ref, b1_ref, w2_ref, b2_ref, w3_ref, b3_ref,
                         out_ref):
    # Inference path: logits only, no logsumexp / mask work.
    out_ref[...] = _mlp_logits(obs_ref, w1_ref, b1_ref, w2_ref, b2_ref, w3_ref, b3_ref)


def _actor_logp_kernel(obs_ref, act_ref, w1_ref, b1_ref, w2_ref, b2_ref, w3_ref,
                       b3_ref, out_ref, *, logp_col):
    logits = _mlp_logits(obs_ref, w1_ref, b1_ref, w2_ref, b2_ref, w3_ref, b3_ref)

    # logsumexp over the lane axis; padded columns hold ~-1e30 so exp() == 0.
    m = jnp.max(logits, axis=-1, keepdims=True)
    lse = jnp.log(jnp.sum(jnp.exp(logits - m), axis=-1, keepdims=True)) + m

    # Gather logits[act] as a masked lane reduction (iota == act); no 0*(-inf).
    # Precondition: 0 <= act < act_dim (out-of-range act silently gives picked=0).
    col = jax.lax.broadcasted_iota(jnp.int32, logits.shape, 1)
    sel = col == act_ref[...]                                  # act_ref: (TB, 1) int32
    picked = jnp.sum(jnp.where(sel, logits, 0.0), axis=-1, keepdims=True)
    logp = picked - lse                                        # (TB, 1)

    # Pack logp into the spare padded column -> single unmasked lane-dense store.
    out_ref[...] = jnp.where(col == logp_col, logp, logits)


# --------------------------------------------------------------------- wrapper

def prepare_actor_weights(params, *, matmul_dtype=jnp.bfloat16):
    """One-time weight preparation, hoisted out of the per-call path.

    - hidden widths zero-padded to multiples of 128 (exact: tanh(0)=0 and matching
      weight rows are zero), so all MXU operands / intermediates are lane-dense;
    - output layer padded to AP = round_up(act_dim + 1, 128) with a -1e30 bias on
      padded columns (ignored by max/logsumexp, relies on f32 logits);
    - matmul operands cast to `matmul_dtype` (bf16 changes numerics vs f32 torch —
      explicit opt-in); biases stay f32.
    Returns (weights_tuple, act_dim, padded_width)."""
    (w1, b1), (w2, b2), (w3, b3) = params
    obs_dim, h1 = w1.shape
    h2 = w2.shape[1]
    act_dim = w3.shape[1]
    h1p, h2p = _round_up(h1, 128), _round_up(h2, 128)
    ap = _round_up(act_dim + 1, 128)

    w1p = jnp.zeros((obs_dim, h1p), jnp.float32).at[:, :h1].set(w1)
    b1p = jnp.zeros((1, h1p), jnp.float32).at[:, :h1].set(jnp.reshape(b1, (1, -1)))
    w2p = jnp.zeros((h1p, h2p), jnp.float32).at[:h1, :h2].set(w2)
    b2p = jnp.zeros((1, h2p), jnp.float32).at[:, :h2].set(jnp.reshape(b2, (1, -1)))
    w3p = jnp.zeros((h2p, ap), jnp.float32).at[:h2, :act_dim].set(w3)
    b3p = jnp.full((1, ap), -1e30, jnp.float32).at[:, :act_dim].set(
        jnp.reshape(b3, (1, -1)).astype(jnp.float32))

    weights = (w1p.astype(matmul_dtype), b1p,
               w2p.astype(matmul_dtype), b2p,
               w3p.astype(matmul_dtype), b3p)
    return jax.block_until_ready(weights), act_dim, ap


def _choose_batch_tile(batch, obs_dim, ap, weight_bytes):
    """Batch tile sized for _NUM_GRID_STEPS grid steps, bounded by a VMEM budget
    (2 buffers * TB * (obs + act + out) f32 + double-buffered resident weights)."""
    per_row = 2 * (obs_dim + 1 + ap) * 4
    avail = max(_VMEM_BUDGET_BYTES - 2 * weight_bytes, 8 * per_row)
    tb_max = max(8, (avail // per_row) // 8 * 8)
    tb_target = max(8, _round_up(-(-batch // _NUM_GRID_STEPS), 8))
    return int(min(tb_target, tb_max))


def _run_actor(obs, act, weights, act_dim, ap):
    B, obs_dim = obs.shape
    weight_bytes = sum(int(a.size) * a.dtype.itemsize for a in weights)
    tb = _choose_batch_tile(B, obs_dim, ap, weight_bytes)
    bp = _round_up(B, tb)
    grid = (bp // tb,)

    obs_p = obs if bp == B else jnp.pad(obs, ((0, bp - B), (0, 0)))

    def batch_spec(width):
        return pl.BlockSpec((tb, width), lambda i: (i, 0))

    def resident_spec(a):  # weights/biases: constant block -> stay resident in VMEM
        return pl.BlockSpec(a.shape, lambda i: (0, 0))

    weight_specs = [resident_spec(a) for a in weights]
    compiler_params = pltpu.CompilerParams(
        dimension_semantics=("parallel",),   # batch tiles shard across TCs on v7x
        vmem_limit_bytes=_VMEM_LIMIT_BYTES)
    out_shape = jax.ShapeDtypeStruct((bp, ap), jnp.float32)

    if act is None:
        out = pl.pallas_call(
            _actor_logits_kernel,
            out_shape=out_shape, grid=grid,
            in_specs=[batch_spec(obs_dim)] + weight_specs,
            out_specs=batch_spec(ap),
            compiler_params=compiler_params,
        )(obs_p, *weights)
        return out[:B, :act_dim], None

    act_i = jnp.reshape(act, (-1, 1)).astype(jnp.int32)
    act_p = act_i if bp == B else jnp.pad(act_i, ((0, bp - B), (0, 0)))
    out = pl.pallas_call(
        functools.partial(_actor_logp_kernel, logp_col=act_dim),
        out_shape=out_shape, grid=grid,
        in_specs=[batch_spec(obs_dim), batch_spec(1)] + weight_specs,
        out_specs=batch_spec(ap),
        compiler_params=compiler_params,
    )(obs_p, act_p, *weights)
    # Both slices live in the same jit region as the pallas_call (single launch).
    return out[:B, :act_dim], out[:B, act_dim]


@functools.partial(jax.jit, static_argnames=("act_dim", "ap"))
def _forward_logits(obs, weights, *, act_dim, ap):
    return _run_actor(obs, None, weights, act_dim, ap)[0]


@functools.partial(jax.jit, static_argnames=("act_dim", "ap"))
def _forward_logp(obs, act, weights, *, act_dim, ap):
    return _run_actor(obs, act, weights, act_dim, ap)


class PallasActor:
    """Pallas TPU implementation of the PyTorch Actor forward pass.

    actor(obs)        -> (logits, None)     # logits parameterize Categorical pi
    actor(obs, act)   -> (logits, logp_a)   # logp_a = pi.log_prob(act)
    """

    def __init__(self, params, *, matmul_dtype=jnp.bfloat16):
        self.weights, self.act_dim, self.ap = prepare_actor_weights(
            params, matmul_dtype=matmul_dtype)

    def __call__(self, obs, act=None):
        if act is None:
            logits = _forward_logits(obs, self.weights,
                                     act_dim=self.act_dim, ap=self.ap)
            return logits, None
        return _forward_logp(obs, jnp.asarray(act), self.weights,
                             act_dim=self.act_dim, ap=self.ap)


# -------------------------------------------------------------- init/reference

def init_params(key, obs_dim, hidden_sizes, act_dim):
    """nn.Linear-style uniform(-1/sqrt(fan_in), 1/sqrt(fan_in)) init; weights stored
    as (in_features, out_features) (transposed vs torch), biases as (1, out)."""
    sizes = [obs_dim] + list(hidden_sizes) + [act_dim]
    params = []
    for j in range(len(sizes) - 1):
        fan_in, fan_out = sizes[j], sizes[j + 1]
        key, kw, kb = jax.random.split(key, 3)
        bound = 1.0 / float(fan_in) ** 0.5
        w = jax.random.uniform(kw, (fan_in, fan_out), jnp.float32, -bound, bound)
        b = jax.random.uniform(kb, (1, fan_out), jnp.float32, -bound, bound)
        params.append((w, b))
    return params


def _reference_forward(obs, params, act, matmul_dtype):
    """Pure-JAX reference with matching matmul operand dtype."""
    (w1, b1), (w2, b2), (w3, b3) = params
    c = matmul_dtype
    h = jnp.tanh(jnp.dot(obs.astype(c), w1.astype(c),
                         preferred_element_type=jnp.float32) + b1)
    h = jnp.tanh(jnp.dot(h.astype(c), w2.astype(c),
                         preferred_element_type=jnp.float32) + b2)
    logits = jnp.dot(h.astype(c), w3.astype(c),
                     preferred_element_type=jnp.float32) + b3
    logp = None
    if act is not None:
        logp = jnp.take_along_axis(
            jax.nn.log_softmax(logits, axis=-1), act[:, None], axis=-1)[:, 0]
    return logits, logp


if __name__ == "__main__":
    key = jax.random.PRNGKey(0)
    B, obs_dim, hidden_sizes, act_dim = 64, 32, (64, 64), 8

    k_obs, k_act, k_par = jax.random.split(key, 3)
    obs = jax.random.normal(k_obs, (B, obs_dim), dtype=jnp.float32)
    act = jax.random.randint(k_act, (B,), 0, act_dim)
    params = init_params(k_par, obs_dim, hidden_sizes, act_dim)

    actor = PallasActor(params)

    # Training path: logits + log-prob of taken actions.
    logits, logp_a = actor(obs, act)
    # Inference path: logits only (the Categorical "pi"); logp_a is None.
    logits_inf, none_logp = actor(obs)
    jax.block_until_ready((logits, logp_a, logits_inf))
    assert none_logp is None
    assert logits.shape == (B, act_dim) and logp_a.shape == (B,)

    # Tight check vs a reference using the same bf16 matmul operands.
    ref_logits, ref_logp = _reference_forward(obs, params, act, jnp.bfloat16)
    assert jnp.allclose(logits, ref_logits, atol=2e-3, rtol=2e-3)
    assert jnp.allclose(logits_inf, ref_logits, atol=2e-3, rtol=2e-3)
    assert jnp.allclose(logp_a, ref_logp, atol=2e-3, rtol=2e-3)

    # Loose sanity check vs a full-f32 reference (bf16 matmul rounding).
    f32_logits, f32_logp = _reference_forward(obs, params, act, jnp.float32)
    assert jnp.allclose(logits, f32_logits, atol=5e-2, rtol=5e-2)
    assert jnp.allclose(logp_a, f32_logp, atol=5e-2, rtol=5e-2)

    # TODO(synk): Categorical sampling / entropy are not part of forward(); pi is
    # represented by its logits.
    print("KERNEL_OK")
</pallas_src>

<mosaic_0001>
module attributes {stable_mosaic.version = 11 : i64} {
  func.func @_actor_logp_kernel(%arg0: i32, %arg1: memref<32x32xf32, #tpu.memory_space<vmem>>, %arg2: memref<32x1xi32, #tpu.memory_space<vmem>>, %arg3: memref<32x128xbf16, #tpu.memory_space<vmem>>, %arg4: memref<1x128xf32, #tpu.memory_space<vmem>>, %arg5: memref<128x128xbf16, #tpu.memory_space<vmem>>, %arg6: memref<1x128xf32, #tpu.memory_space<vmem>>, %arg7: memref<128x128xbf16, #tpu.memory_space<vmem>>, %arg8: memref<1x128xf32, #tpu.memory_space<vmem>>, %arg9: memref<32x128xf32, #tpu.memory_space<vmem>>) attributes {dimension_semantics = [#tpu.dimension_semantics<parallel>], iteration_bounds = array<i64: 2>, scalar_prefetch = 0 : i64, scratch_operands = 0 : i64, tpu.core_type = #tpu.core_type<tc>, window_params = [{transform_indices = @transform_0, window_bounds = array<i64: 32, 32>}, {transform_indices = @transform_1, window_bounds = array<i64: 32, 1>}, {pipeline_mode = #tpu.pipeline_mode<synchronous>, transform_indices = @transform_2, window_bounds = array<i64: 32, 128>}, {pipeline_mode = #tpu.pipeline_mode<synchronous>, transform_indices = @transform_3, window_bounds = array<i64: 1, 128>}, {pipeline_mode = #tpu.pipeline_mode<synchronous>, transform_indices = @transform_4, window_bounds = array<i64: 128, 128>}, {pipeline_mode = #tpu.pipeline_mode<synchronous>, transform_indices = @transform_5, window_bounds = array<i64: 1, 128>}, {pipeline_mode = #tpu.pipeline_mode<synchronous>, transform_indices = @transform_6, window_bounds = array<i64: 128, 128>}, {pipeline_mode = #tpu.pipeline_mode<synchronous>, transform_indices = @transform_7, window_bounds = array<i64: 1, 128>}, {transform_indices = @transform_8, window_bounds = array<i64: 32, 128>}]} {
    %c0 = arith.constant 0 : index
    %c0_0 = arith.constant 0 : index
    %0 = vector.load %arg1[%c0, %c0_0] : memref<32x32xf32, #tpu.memory_space<vmem>>, vector<32x32xf32>
    %1 = arith.truncf %0 : vector<32x32xf32> to vector<32x32xbf16>
    %c0_1 = arith.constant 0 : index
    %c0_2 = arith.constant 0 : index
    %2 = vector.load %arg3[%c0_1, %c0_2] : memref<32x128xbf16, #tpu.memory_space<vmem>>, vector<32x128xbf16>
    %cst = arith.constant dense<0.000000e+00> : vector<32x128xf32>
    %3 = tpu.matmul %1, %2, %cst {dimension_numbers = #tpu.dot_dimension_numbers<[1], [0], [0], [1], [0, 0, 1, 1], [], []>} : vector<32x32xbf16>, vector<32x128xbf16>, vector<32x128xf32> -> vector<32x128xf32>
    %c0_3 = arith.constant 0 : index
    %c0_4 = arith.constant 0 : index
    %4 = vector.load %arg4[%c0_3, %c0_4] : memref<1x128xf32, #tpu.memory_space<vmem>>, vector<1x128xf32>
    %5 = vector.broadcast %4 : vector<1x128xf32> to vector<32x128xf32>
    %6 = arith.addf %3, %5 : vector<32x128xf32>
    %7 = math.tanh %6 : vector<32x128xf32>
    %8 = arith.truncf %7 : vector<32x128xf32> to vector<32x128xbf16>
    %c0_5 = arith.constant 0 : index
    %c0_6 = arith.constant 0 : index
    %9 = vector.load %arg5[%c0_5, %c0_6] : memref<128x128xbf16, #tpu.memory_space<vmem>>, vector<128x128xbf16>
    %cst_7 = arith.constant dense<0.000000e+00> : vector<32x128xf32>
    %10 = tpu.matmul %8, %9, %cst_7 {dimension_numbers = #tpu.dot_dimension_numbers<[1], [0], [0], [1], [0, 0, 1, 1], [], []>} : vector<32x128xbf16>, vector<128x128xbf16>, vector<32x128xf32> -> vector<32x128xf32>
    %c0_8 = arith.constant 0 : index
    %c0_9 = arith.constant 0 : index
    %11 = vector.load %arg6[%c0_8, %c0_9] : memref<1x128xf32, #tpu.memory_space<vmem>>, vector<1x128xf32>
    %12 = vector.broadcast %11 : vector<1x128xf32> to vector<32x128xf32>
    %13 = arith.addf %10, %12 : vector<32x128xf32>
    %14 = math.tanh %13 : vector<32x128xf32>
    %15 = arith.truncf %14 : vector<32x128xf32> to vector<32x128xbf16>
    %c0_10 = arith.constant 0 : index
    %c0_11 = arith.constant 0 : index
    %16 = vector.load %arg7[%c0_10, %c0_11] : memref<128x128xbf16, #tpu.memory_space<vmem>>, vector<128x128xbf16>
    %cst_12 = arith.constant dense<0.000000e+00> : vector<32x128xf32>
    %17 = tpu.matmul %15, %16, %cst_12 {dimension_numbers = #tpu.dot_dimension_numbers<[1], [0], [0], [1], [0, 0, 1, 1], [], []>} : vector<32x128xbf16>, vector<128x128xbf16>, vector<32x128xf32> -> vector<32x128xf32>
    %c0_13 = arith.constant 0 : index
    %c0_14 = arith.constant 0 : index
    %18 = vector.load %arg8[%c0_13, %c0_14] : memref<1x128xf32, #tpu.memory_space<vmem>>, vector<1x128xf32>
    %19 = vector.broadcast %18 : vector<1x128xf32> to vector<32x128xf32>
    %20 = arith.addf %17, %19 : vector<32x128xf32>
    %cst_15 = arith.constant dense<0xFF800000> : vector<32xf32>
    %21 = vector.multi_reduction <maximumf>, %20, %cst_15 [1] : vector<32x128xf32> to vector<32xf32>
    %22 = vector.shape_cast %21 : vector<32xf32> to vector<32x1xf32>
    %23 = vector.broadcast %22 : vector<32x1xf32> to vector<32x128xf32>
    %24 = arith.subf %20, %23 : vector<32x128xf32>
    %25 = math.exp %24 : vector<32x128xf32>
    %cst_16 = arith.constant dense<0.000000e+00> : vector<32xf32>
    %26 = vector.multi_reduction <add>, %25, %cst_16 [1] : vector<32x128xf32> to vector<32xf32>
    %27 = vector.shape_cast %26 : vector<32xf32> to vector<32x1xf32>
    %28 = math.log %27 : vector<32x1xf32>
    %29 = arith.addf %28, %22 : vector<32x1xf32>
    %30 = tpu.iota {dimensions = array<i32: 1>} : vector<32x128xi32>
    %c0_17 = arith.constant 0 : index
    %c0_18 = arith.constant 0 : index
    %31 = vector.load %arg2[%c0_17, %c0_18] : memref<32x1xi32, #tpu.memory_space<vmem>>, vector<32x1xi32>
    %32 = vector.broadcast %31 : vector<32x1xi32> to vector<32x128xi32>
    %33 = arith.cmpi eq, %30, %32 : vector<32x128xi32>
    %cst_19 = arith.constant 0.000000e+00 : f32
    %34 = vector.broadcast %cst_19 : f32 to vector<32x128xf32>
    %35 = arith.select %33, %20, %34 : vector<32x128xi1>, vector<32x128xf32>
    %cst_20 = arith.constant dense<0.000000e+00> : vector<32xf32>
    %36 = vector.multi_reduction <add>, %35, %cst_20 [1] : vector<32x128xf32> to vector<32xf32>
    %37 = vector.shape_cast %36 : vector<32xf32> to vector<32x1xf32>
    %38 = arith.subf %37, %29 : vector<32x1xf32>
    %c8_i32 = arith.constant 8 : i32
    %39 = vector.broadcast %c8_i32 : i32 to vector<32x128xi32>
    %40 = arith.cmpi eq, %30, %39 : vector<32x128xi32>
    %41 = vector.shape_cast %38 : vector<32x1xf32> to vector<32x1xf32>
    %42 = vector.broadcast %41 : vector<32x1xf32> to vector<32x128xf32>
    %43 = arith.select %40, %42, %20 : vector<32x128xi1>, vector<32x128xf32>
    %c0_21 = arith.constant 0 : index
    %c0_22 = arith.constant 0 : index
    %44 = vector.load %arg9[%c0_21, %c0_22] : memref<32x128xf32, #tpu.memory_space<vmem>>, vector<32x128xf32>
    tpu.vector_store %arg9[%c0_21, %c0_22], %43 {strides = array<i32>} : memref<32x128xf32, #tpu.memory_space<vmem>>, vector<32x128xf32>,
    return
  }
  func.func @transform_0(%arg0: i32) -> (i32, i32) {
    %c0_i32 = arith.constant 0 : i32
    %c0_i32_0 = arith.constant 0 : i32
    return %arg0, %c0_i32 : i32, i32
  }
  func.func @transform_1(%arg0: i32) -> (i32, i32) {
    %c0_i32 = arith.constant 0 : i32
    %c0_i32_0 = arith.constant 0 : i32
    return %arg0, %c0_i32 : i32, i32
  }
  func.func @transform_2(%arg0: i32) -> (i32, i32) {
    %c0_i32 = arith.constant 0 : i32
    %c0_i32_0 = arith.constant 0 : i32
    %c0_i32_1 = arith.constant 0 : i32
    return %c0_i32, %c0_i32_0 : i32, i32
  }
  func.func @transform_3(%arg0: i32) -> (i32, i32) {
    %c0_i32 = arith.constant 0 : i32
    %c0_i32_0 = arith.constant 0 : i32
    %c0_i32_1 = arith.constant 0 : i32
    return %c0_i32, %c0_i32_0 : i32, i32
  }
  func.func @transform_4(%arg0: i32) -> (i32, i32) {
    %c0_i32 = arith.constant 0 : i32
    %c0_i32_0 = arith.constant 0 : i32
    %c0_i32_1 = arith.constant 0 : i32
    return %c0_i32, %c0_i32_0 : i32, i32
  }
  func.func @transform_5(%arg0: i32) -> (i32, i32) {
    %c0_i32 = arith.constant 0 : i32
    %c0_i32_0 = arith.constant 0 : i32
    %c0_i32_1 = arith.constant 0 : i32
    return %c0_i32, %c0_i32_0 : i32, i32
  }
  func.func @transform_6(%arg0: i32) -> (i32, i32) {
    %c0_i32 = arith.constant 0 : i32
    %c0_i32_0 = arith.constant 0 : i32
    %c0_i32_1 = arith.constant 0 : i32
    return %c0_i32, %c0_i32_0 : i32, i32
  }
  func.func @transform_7(%arg0: i32) -> (i32, i32) {
    %c0_i32 = arith.constant 0 : i32
    %c0_i32_0 = arith.constant 0 : i32
    %c0_i32_1 = arith.constant 0 : i32
    return %c0_i32, %c0_i32_0 : i32, i32
  }
  func.func @transform_8(%arg0: i32) -> (i32, i32) {
    %c0_i32 = arith.constant 0 : i32
    %c0_i32_0 = arith.constant 0 : i32
    return %arg0, %c0_i32 : i32, i32
  }
}

</mosaic_0001>

<bundles_post_ra>
// kernel: _forward_logp.1
= control target key start
LH: loop header
LB: loop body
LE: loop exit
PB: predicated region body
PF: predicated region fallthrough
CT: control target
= control target key end

     0   :  { %s1047_s27 = smov 0   ;;  %s1167_s0 = inlined_call_operand.vmem [shape: f32[64,32], index: 0, kind: input, shape index: {}]   ;;  %s1168_s1 = inlined_call_operand.vmem [shape: s32[64,1], index: 1, kind: input, shape index: {}]   ;;  %s1169_s2 = inlined_call_operand.vmem [shape: bf16[32,128], index: 2, kind: input, shape index: {}]   ;;  %s1170_s3 = inlined_call_operand.vmem [shape: f32[1,128], index: 3, kind: input, shape index: {}]   ;;  %s1171_s4 = inlined_call_operand.vmem [shape: bf16[128,128], index: 4, kind: input, shape index: {}]   ;;  %s1172_s5 = inlined_call_operand.vmem [shape: f32[1,128], index: 5, kind: input, shape index: {}]   ;;  %s1173_s6 = inlined_call_operand.vmem [shape: bf16[128,128], index: 6, kind: input, shape index: {}]   ;;  %s1174_s7 = inlined_call_operand.vmem [shape: f32[1,128], index: 7, kind: input, shape index: {}]   ;;  %s1175_s8 = inlined_call_operand.vmem [shape: f32[64,128], index: 8, kind: output, shape index: {}]  }
   0x1 LB: > { %s824_s28 = sadd.s32 4294967295, %s999_s27   ;;  %p828_p0 = scmp.ge.s32.totalorder %s999_s27, 1  ;;  %s999_s27 = sphi %s1047_s27, %s18_s27  }
   0x2   : > { %p274_p1 = scmp.lt.s32.totalorder %s999_s27, 3 }
   0x4   : > { %p275_p2 = pnand %p828_p0, %p274_p1 }
   0x5   : > { %v943_v0 = vld [vmem:[%s1169_s2] sm:$0xff] (!%p275_p2)   ;;  %s829_s9 = sshll.u32 (!%p275_p2), %s824_s28, 2  ;;  %v944_v1 = vld [vmem:[%s1169_s2 + $0x8] sm:$0xff] (!%p275_p2)   ;;  %v947_v4 = vld [vmem:[%s1171_s4 + $0x10] sm:$0xff] (!%p275_p2)   ;;  %vm361_vm0 = vcmask (!%p275_p2), 261120   ;;  %v1001_v54 = vmov (!%p275_p2), 0  }
   0x6   : > { %278 = sbr.rel (%p275_p2) target bundleno = 1023 (0x3ff), region = 52  ;;  %p314_p3 = scmp.lt.s32.totalorder (!%p275_p2), %s829_s9, 7  ;;  %884 = vmatprep.subr.bf16.mxu0 (!%p275_p2), %v943_v0  ;;  %v945_v2 = vld [vmem:[%s1171_s4] sm:$0xff] (!%p275_p2)   ;;  %v946_v3 = vld [vmem:[%s1171_s4 + $0x8] sm:$0xff] (!%p275_p2)   ;;  %v948_v11 = vld [vmem:[%s1171_s4 + $0x18] sm:$0xff] (!%p275_p2)   ;;  %942 = vset.pattern.permute.xlu1 (!%p275_p2), %v1001_v54 }
   0x7   : > { %885 = vmatpush3.bf16.msra.mxu0 (!%p275_p2), %v943_v0  ;;  %892 = vmatprep.subr.bf16.mxu1 (!%p275_p2), %v945_v2  ;;  %v949_v12 = vld [vmem:[%s1171_s4 + $0x20] sm:$0xff] (!%p275_p2)   ;;  %v950_v13 = vld [vmem:[%s1171_s4 + $0x28] sm:$0xff] (!%p275_p2)   ;;  %v951_v14 = vld [vmem:[%s1171_s4 + $0x30] sm:$0xff] (!%p275_p2)  }
   0x8   : > { %886 = vmatprep.subr.bf16.mxu0 (!%p275_p2), %v944_v1  ;;  %893 = vmatpush3.bf16.msra.mxu1 (!%p275_p2), %v945_v2  ;;  %v952_v15 = vld [vmem:[%s1171_s4 + $0x38] sm:$0xff] (!%p275_p2)   ;;  %v953_v16 = vld [vmem:[%s1173_s6] sm:$0xff] (!%p275_p2)   ;;  %v954_v17 = vld [vmem:[%s1173_s6 + $0x8] sm:$0xff] (!%p275_p2)  }
   0x9   : > { %894 = vmatprep.subr.bf16.mxu1 (!%p275_p2), %v946_v3  ;;  %v955_v18 = vld [vmem:[%s1173_s6 + $0x10] sm:$0xff] (!%p275_p2)   ;;  %v835_v19 = vld [vmem:[%s1170_s3] ss:$0 sm:$0xff] (!%p275_p2)  ;;  %v956_v34 = vld [vmem:[%s1173_s6 + $0x18] sm:$0xff] (!%p275_p2)   ;;  %941 = vset.pattern.permute.xlu0 (!%p275_p2), %v1001_v54 }
   0xa   : > { %v957_v35 = vld [vmem:[%s1173_s6 + $0x20] sm:$0xff] (!%p275_p2)   ;;  %v958_v36 = vld [vmem:[%s1173_s6 + $0x28] sm:$0xff] (!%p275_p2)   ;;  %v959_v37 = vld [vmem:[%s1173_s6 + $0x30] sm:$0xff] (!%p275_p2)  }
   0xb   : > { %887 = vmatpush3.bf16.msra.mxu0 (!%p275_p2), %v944_v1  ;;  %v960_v38 = vld [vmem:[%s1173_s6 + $0x38] sm:$0xff] (!%p275_p2)   ;;  %v840_v39 = vld [vmem:[%s1172_s5] ss:$0 sm:$0xff] (!%p275_p2) }
   0xc   : > { %895 = vmatpush3.bf16.msra.mxu1 (!%p275_p2), %v946_v3  ;;  %912 = vmatprep.subr.bf16.mxu0 (!%p275_p2), %v953_v16  ;;  %v849_v55 = vld [vmem:[%s1174_s7] ss:$0 sm:$0xff] (!%p275_p2) }
   0xd   : > { %s1177_s9 = smov (!%p314_p3, %s829_s9), 7  ;;  %896 = vmatprep.subr.bf16.mxu1 %v947_v4 }
   0xe   : > { %s1067_s16 = sshll.u32 %s1177_s9, 3 }
   0xf   : > { %s317_s21 = scalar_lea.vmem %s1167_s0, %s1067_s16  ;;  %s323_s15 = scalar_lea.vmem %s1168_s1, %s1067_s16 }
  0x10   : > { %v332_v5 = vld [vmem:[%s317_s21] sm:$0xff]  ;;  %v333_v6 = vld [vmem:[%s317_s21 + $0x8] sm:$0xff]  ;;  %v334_v7 = vld [vmem:[%s317_s21 + $0x10] sm:$0xff]  ;;  %897 = vmatpush3.bf16.msra.mxu1 %v947_v4  ;;  %s329_s19 = scalar_lea.vmem %s1175_s8, %s1067_s16 }
  0x11   : > { %v336_v8 = vpack.c.bf16 %v333_v6, %v332_v5  ;;  %v335_v9 = vld [vmem:[%s317_s21 + $0x18] sm:$0xff]  ;;  %898 = vmatprep.subr.bf16.mxu1 %v948_v11  ;;  %v712_v0 = vld [vmem:[%s323_s15 + $0x8] sm:$0xff]  ;;  %v713_v1 = vld [vmem:[%s323_s15 + $0x10] sm:$0xff] }
  0x12   : > { %v337_v10 = vpack.c.bf16 %v335_v9, %v334_v7  ;;  %v711_v2 = vld [vmem:[%s323_s15] sm:$0xff]  ;;  %v714_v3 = vld [vmem:[%s323_s15 + $0x18] sm:$0xff] }
  0x13   : > { %888 = vmatprep.mubr.msk.bf16.mxu0 %vm361_vm0, %v336_v8 }
  0x14   : > { %889 = vmatmul.mubr.msk.bf16.vlgmr.msra.gmra.mrb[0].mxu0 %vm361_vm0, %v337_v10  ;;  %899 = vmatpush3.bf16.msra.mxu1 %v948_v11 }
  0x15   : > { %900 = vmatprep.subr.bf16.mxu1 %v949_v12  ;;  %913 = vmatpush3.bf16.msra.mxu0 %v953_v16 }
  0x16   : > { %914 = vmatprep.subr.bf16.mxu0 %v954_v17 }
  0x18   : > { %901 = vmatpush3.bf16.msra.mxu1 %v949_v12 }
  0x19   : > { %902 = vmatprep.subr.bf16.mxu1 %v950_v13  ;;  %915 = vmatpush3.bf16.msra.mxu0 %v954_v17  ;;  %v709_v17 = vlaneseq }
  0x1a   : > { %916 = vmatprep.subr.bf16.mxu0 %v955_v18 }
  0x1c   : > { %903 = vmatpush3.bf16.msra.mxu1 %v950_v13 }
  0x1d   : > { %904 = vmatprep.subr.bf16.mxu1 %v951_v14  ;;  %917 = vmatpush3.bf16.msra.mxu0 %v955_v18 }
  0x1e   : > { %918 = vmatprep.subr.bf16.mxu0 %v956_v34 }
  0x20   : > { %905 = vmatpush3.bf16.msra.mxu1 %v951_v14 }
  0x21   : > { %906 = vmatprep.subr.bf16.mxu1 %v952_v15  ;;  %919 = vmatpush3.bf16.msra.mxu0 %v956_v34 }
  0x22   : > { %920 = vmatprep.subr.bf16.mxu0 %v957_v35 }
  0x24   : > { %907 = vmatpush3.bf16.msra.mxu1 %v952_v15 }
  0x25   : > { %921 = vmatpush3.bf16.msra.mxu0 %v957_v35 }
  0x26   : > { %922 = vmatprep.subr.bf16.mxu0 %v958_v36 }
  0x29   : > { %923 = vmatpush3.bf16.msra.mxu0 %v958_v36 }
  0x2a   : > { %924 = vmatprep.subr.bf16.mxu0 %v959_v37 }
  0x2d   : > { %925 = vmatpush3.bf16.msra.mxu0 %v959_v37 }
  0x2e   : > { %926 = vmatprep.subr.bf16.mxu0 %v960_v38 }
  0x31   : > { %927 = vmatpush3.bf16.msra.mxu0 %v960_v38 }
  0xe7   : > { %v890_v20 = vpop.f32.mrb[0].mxu0 }
  0xe8   : > { %v411_v21 = vadd.f32 %v890_v20, %v835_v19  ;;  %v402_v22 = vpop.f32.mrb[1].mxu0 }
  0xe9   : > { %v403_v23 = vadd.f32 %v835_v19, %v402_v22  ;;  %v891_v24 = vpop.f32.mrb[2].mxu0 }
  0xea   : > { %961 = vtanh.f32 %v411_v21  ;;  %v414_v25 = vadd.f32 %v891_v24, %v835_v19  ;;  %v405_v26 = vpop.f32.mrb[3].mxu0  ;;  %v710_v21 = vand.u32 127, %v709_v17 }
  0xeb   : > { %963 = vtanh.f32 %v403_v23  ;;  %v406_v27 = vadd.f32 %v835_v19, %v405_v26 }
  0xec   : > { %965 = vtanh.f32 %v414_v25  ;;  %vm747_vm5 = vcmp.eq.s32.totalorder %v710_v21, 8 }
  0xed   : > { %967 = vtanh.f32 %v406_v27 }
  0xf4   : > { %v962_v28 = vpop.eup %961 }
  0xf5   : > { %v964_v29 = vpop.eup %963 }
  0xf6   : > { %v966_v30 = vpop.eup %965 }
  0xf7   : > { %v968_v31 = vpop.eup %967  ;;  %v422_v32 = vpack.c.bf16 %v966_v30, %v962_v28 }
  0xf8   : > { %v421_v33 = vpack.c.bf16 %v968_v31, %v964_v29 }
  0xfa   : > { %908 = vmatprep.mubr.bf16.mxu1 %v421_v33 }
  0xfb   : > { %909 = vmatmul.mubr.bf16.vlgmr.msra.gmra.mrb[0].mxu1 %v422_v32 }
 0x1ce   : > { %v910_v40 = vpop.f32.mrb[0].mxu1 }
 0x1cf   : > { %v537_v41 = vadd.f32 %v910_v40, %v840_v39  ;;  %v528_v42 = vpop.f32.mrb[1].mxu1 }
 0x1d0   : > { %v529_v43 = vadd.f32 %v840_v39, %v528_v42  ;;  %v911_v44 = vpop.f32.mrb[2].mxu1 }
 0x1d1   : > { %969 = vtanh.f32 %v537_v41  ;;  %v540_v45 = vadd.f32 %v911_v44, %v840_v39  ;;  %v531_v46 = vpop.f32.mrb[3].mxu1 }
 0x1d2   : > { %971 = vtanh.f32 %v529_v43  ;;  %v532_v47 = vadd.f32 %v840_v39, %v531_v46 }
 0x1d3   : > { %973 = vtanh.f32 %v540_v45 }
 0x1d4   : > { %975 = vtanh.f32 %v532_v47 }
 0x1db   : > { %v970_v48 = vpop.eup %969 }
 0x1dc   : > { %v972_v49 = vpop.eup %971 }
 0x1dd   : > { %v974_v50 = vpop.eup %973 }
 0x1de   : > { %v976_v51 = vpop.eup %975  ;;  %v548_v52 = vpack.c.bf16 %v974_v50, %v970_v48 }
 0x1df   : > { %v547_v53 = vpack.c.bf16 %v976_v51, %v972_v49 }
 0x1e1   : > { %928 = vmatprep.mubr.bf16.mxu0 %v547_v53 }
 0x1e2   : > { %929 = vmatmul.mubr.bf16.vlgmr.msra.gmra.mrb[4].mxu0 %v548_v52 }
 0x2b5   : > { %v930_v56 = vpop.f32.mrb[4].mxu0 }
 0x2b6   : > { %v1124_v57 = vadd.f32 %v930_v56, %v849_v55  ;;  %v654_v58 = vpop.f32.mrb[5].mxu0 }
 0x2b7   : > { %v1126_v59 = vadd.f32 %v849_v55, %v654_v58  ;;  %v931_v60 = vpop.f32.mrb[6].mxu0 }
 0x2b8   : > { %673 = vmax.xlane.f32.xlu1 %v1124_v57  ;;  %v657_v61 = vpop.f32.mrb[7].mxu0  ;;  %v1130_v62 = vadd.f32 %v931_v60, %v849_v55 }
 0x2b9   : > { %669 = vmax.xlane.f32.xlu0 %v1126_v59  ;;  %v1132_v63 = vadd.f32 %v849_v55, %v657_v61 }
 0x2bc   : > { %675 = vmax.xlane.f32.xlu1 %v1130_v62 }
 0x2bd   : > { %671 = vmax.xlane.f32.xlu0 %v1132_v63 }
 0x2cd   : > { %719 = vperm.xlu1 %942, %v712_v0  }
 0x2d1   : > { %722 = vperm.xlu1 %942, %v713_v1  }
 0x2d3   : > { %716 = vperm.xlu0 %941, %v711_v2  }
 0x2d5   : > { %725 = vperm.xlu1 %942, %v714_v3  }
 0x345   : > { %v674_v4 = vpop.xlane.xlu1 %673 }
 0x346   : > { %v679_v5 = vsub.f32 %v1124_v57, %v674_v4  ;;  %v670_v6 = vpop.xlane.xlu0 %669 }
 0x347   : > { %v677_v7 = vsub.f32 %v1126_v59, %v670_v6 }
 0x348   : > { %v685_v10 = vmul.f32 1.442695, %v679_v5 }
 0x349   : > { %v681_v8 = vmul.f32 1.442695, %v677_v7  ;;  %v1142_v9 = vpop.xlane.xlu1 %675 }
 0x34a   : > { %v672_v11 = vpop.xlane.xlu0 %671  ;;  %v680_v12 = vsub.f32 %v1130_v62, %v1142_v9 }
 0x34b   : > { %977 = vpow2.f32 %v681_v8  ;;  %v678_v13 = vsub.f32 %v1132_v63, %v672_v11 }
 0x34c   : > { %979 = vpow2.f32 %v685_v10  ;;  %v687_v15 = vmul.f32 1.442695, %v680_v12 }
 0x34d   : > { %v683_v14 = vmul.f32 1.442695, %v678_v13  ;;  %v720_v16 = vpop.permute.xlu1 %719 }
 0x34e   : > { %vm728_vm3 = vcmp.eq.s32.totalorder %v710_v21, %v720_v16 }
 0x34f   : > { %981 = vpow2.f32 %v683_v14  ;;  %v732_v28 = vsel %vm728_vm3, %v1132_v63, 0.0 }
 0x350   : > { %983 = vpow2.f32 %v687_v15 }
 0x351   : > { %v723_v19 = vpop.permute.xlu1 %722 }
 0x352   : > { %vm729_vm1 = vcmp.eq.s32.totalorder %v710_v21, %v723_v19  ;;  %v717_v23 = vpop.permute.xlu0 %716 }
 0x353   : > { %v733_v25 = vsel %vm729_vm1, %v1124_v57, 0.0  ;;  %vm727_vm2 = vcmp.eq.s32.totalorder %v710_v21, %v717_v23 }
 0x354   : > { %v731_v26 = vsel %vm727_vm2, %v1126_v59, 0.0 }
 0x355   : > { %v978_v18 = vpop.eup %977  ;;  %v726_v27 = vpop.permute.xlu1 %725 }
 0x356   : > { %689 = vadd.xlane.f32.xlu1 %v978_v18  ;;  %v980_v20 = vpop.eup %979  ;;  %vm730_vm4 = vcmp.eq.s32.totalorder %v710_v21, %v726_v27 }
 0x357   : > { %v734_v29 = vsel %vm730_vm4, %v1130_v62, 0.0 }
 0x359   : > { %v982_v22 = vpop.eup %981 }
 0x35a   : > { %693 = vadd.xlane.f32.xlu1 %v980_v20  ;;  %691 = vadd.xlane.f32.xlu0 %v982_v22  ;;  %v984_v24 = vpop.eup %983 }
 0x35e   : > { %695 = vadd.xlane.f32.xlu1 %v984_v24  ;;  %739 = vadd.xlane.f32.xlu0 %v733_v25 }
 0x362   : > { %735 = vadd.xlane.f32.xlu1 %v731_v26 }
 0x366   : > { %737 = vadd.xlane.f32.xlu1 %v732_v28 }
 0x36a   : > { %741 = vadd.xlane.f32.xlu1 %v734_v29 }
 0x3e3   : > { %v690_v30 = vpop.xlane.xlu1 %689 }
 0x3e4   : > { %985 = vlog2.f32 %v690_v30 }
 0x3e7   : > { %v694_v31 = vpop.xlane.xlu1 %693  ;;  %v692_v32 = vpop.xlane.xlu0 %691 }
 0x3e8   : > { %987 = vlog2.f32 %v694_v31 }
 0x3e9   : > { %989 = vlog2.f32 %v692_v32 }
 0x3eb   : > { %v696_v33 = vpop.xlane.xlu1 %695  ;;  %v740_v47 = vpop.xlane.xlu0 %739 }
 0x3ec   : > { %991 = vlog2.f32 %v696_v33 }
 0x3ee   : > { %v986_v34 = vpop.eup %985 }
 0x3ef   : > { %v698_v35 = vmul.f32 0.6931472, %v986_v34  ;;  %v736_v36 = vpop.xlane.xlu1 %735 }
 0x3f1   : > { %v705_v37 = vadd.f32 %v698_v35, %v670_v6 }
 0x3f2   : > { %v988_v38 = vpop.eup %987 }
 0x3f3   : > { %v990_v39 = vpop.eup %989  ;;  %v702_v40 = vmul.f32 0.6931472, %v988_v38  ;;  %v743_v41 = vsub.f32 %v736_v36, %v705_v37  ;;  %v738_v43 = vpop.xlane.xlu1 %737 }
 0x3f4   : > { %v700_v42 = vmul.f32 0.6931472, %v990_v39 }
 0x3f5   : > { %v707_v44 = vadd.f32 %v702_v40, %v674_v4  ;;  %v748_v45 = vsel %vm747_vm5, %v743_v41, %v1126_v59 }
 0x3f6   : > { %v992_v46 = vpop.eup %991  ;;  %752 = vst [vmem:[%s329_s19] sm:$0xff] %v748_v45  ;;  %v706_v48 = vadd.f32 %v700_v42, %v672_v11 }
 0x3f7   : > { %v704_v49 = vmul.f32 0.6931472, %v992_v46  ;;  %v745_v50 = vsub.f32 %v740_v47, %v707_v44  ;;  %v742_v55 = vpop.xlane.xlu1 %741 }
 0x3f8   : > { %v744_v51 = vsub.f32 %v738_v43, %v706_v48 }
 0x3f9   : > { %v750_v52 = vsel %vm747_vm5, %v745_v50, %v1124_v57  ;;  %v708_v53 = vadd.f32 %v704_v49, %v1142_v9 }
 0x3fa   : > { %v749_v54 = vsel %vm747_vm5, %v744_v51, %v1132_v63  ;;  %754 = vst [vmem:[%s329_s19 + $0x10] sm:$0xff] %v750_v52 }
 0x3fb   : > { %753 = vst [vmem:[%s329_s19 + $0x8] sm:$0xff] %v749_v54  ;;  %v746_v56 = vsub.f32 %v742_v55, %v708_v53 }
 0x3fd   : > { %v751_v58 = vsel %vm747_vm5, %v746_v56, %v1130_v62 }
 0x3fe   : > { %755 = vst [vmem:[%s329_s19 + $0x18] sm:$0xff] %v751_v58 }
 0x3ff PF: > { %s18_s27 = sadd.s32 1, %s999_s27  }
 0x400   : > { %p15_p4 = scmp.ge.s32.totalorder %s18_s27, 4  }
 0x402   :  { %17 = sbr.rel (!%p15_p4) target bundleno = 1 (0x1), region = 85 }

</bundles_post_ra>
